<compile_context>
chip_gen: v7x
topology: tpu7x:2x2x1
jax: 0.10.0
libtpu: 0.0.40
codegen_flags: <defaults>
</compile_context>

<pallas_src>
import functools

import jax
import jax.numpy as jnp
from jax.experimental import pallas as pl
from jax.experimental.pallas import tpu as pltpu

LN_EPS = 1e-5      # PyTorch nn.LayerNorm default
OUT_W = 8          # stored output width (real logits = 3); equals full last dim


def _round_up(x, m):
    return ((x + m - 1) // m) * m


def preferred_compute_dtype():
    """bf16 MXU inputs on v6e/v7x, f32 otherwise (bit-exact parity path)."""
    try:
        kind = jax.devices()[0].device_kind.lower()
        if ("v6" in kind) or ("v7" in kind):
            return jnp.bfloat16
    except Exception:
        pass
    return jnp.float32


def _layernorm_relu(h, gamma, beta):
    """Single-pass LayerNorm (biased variance, matches PyTorch) + ReLU."""
    inv_n = 1.0 / h.shape[-1]
    s = jnp.sum(h, axis=-1, keepdims=True)
    ss = jnp.sum(h * h, axis=-1, keepdims=True)
    mu = s * inv_n
    var = jnp.maximum(ss * inv_n - mu * mu, 0.0)
    y = (h - mu) * jax.lax.rsqrt(var + LN_EPS) * gamma + beta
    return jnp.maximum(y, 0.0)


def mlp3_kernel(x_ref, p1_ref, p2_ref, p3_ref, o_ref, *, d_in, h1, h2):
    f32 = jnp.float32
    cdt = p1_ref.dtype                                           # compute dtype

    # ---- fc1 + LayerNorm + ReLU -------------------------------------------
    h = jnp.dot(x_ref[...], p1_ref[:d_in, :],
                preferred_element_type=f32)                      # (TB, H1) f32
    h = h + p1_ref[d_in:d_in + 1, :].astype(f32)                 # + b1
    h = _layernorm_relu(h,
                        p1_ref[d_in + 1:d_in + 2, :].astype(f32),    # gamma1
                        p1_ref[d_in + 2:d_in + 3, :].astype(f32))    # beta1
    # dropout: identity (eval mode)

    # ---- fc2 + LayerNorm + ReLU -------------------------------------------
    h = jnp.dot(h.astype(cdt), p2_ref[:h1, :],
                preferred_element_type=f32)                      # (TB, H2) f32
    h = h + p2_ref[h1:h1 + 1, :].astype(f32)                     # + b2
    h = _layernorm_relu(h,
                        p2_ref[h1 + 1:h1 + 2, :].astype(f32),        # gamma2
                        p2_ref[h1 + 2:h1 + 3, :].astype(f32))        # beta2
    # dropout: identity (eval mode)

    # ---- fc3 (narrow 8-wide stored slab; real logits = first 3 columns) ----
    out = jnp.dot(h.astype(cdt), p3_ref[:h2, :],
                  preferred_element_type=f32)                    # (TB, OUT_W)
    o_ref[...] = out + p3_ref[h2:h2 + 1, :].astype(f32)          # + b3 (padded)


def pack_params(params, compute_dtype=jnp.float32):
    """Pack 11 parameter arrays into 3 (done ONCE, outside the forward path).

    p1 = [w1; b1; g1; bt1]  (d_in+3, h1)
    p2 = [w2; b2; g2; bt2]  (h1+3,  h2)
    p3 = [w3_pad; b3_pad]   (h2+1,  OUT_W)   (columns zero-padded to OUT_W)
    Cast to compute_dtype (bf16 halves HBM/VMEM weight footprint on v6e/v7x).
    """
    d_in = params["w1"].shape[0]
    h1 = params["w1"].shape[1]
    h2 = params["w2"].shape[1]
    n_out = params["w3"].shape[1]
    assert n_out <= OUT_W

    p1 = jnp.concatenate(
        [params["w1"], params["b1"], params["g1"], params["bt1"]], axis=0)
    p2 = jnp.concatenate(
        [params["w2"], params["b2"], params["g2"], params["bt2"]], axis=0)
    w3p = jnp.zeros((h2, OUT_W), jnp.float32).at[:, :n_out].set(params["w3"])
    b3p = jnp.zeros((1, OUT_W), jnp.float32).at[:, :n_out].set(params["b3"])
    p3 = jnp.concatenate([w3p, b3p], axis=0)

    return {
        "p1": p1.astype(compute_dtype),
        "p2": p2.astype(compute_dtype),
        "p3": p3.astype(compute_dtype),
        "d_in": d_in, "h1": h1, "h2": h2, "n_out": n_out,
        "compute_dtype": compute_dtype,
    }


def dnn_3layers_forward(x, packed, *, block_rows=4096):
    """x: (B, T, F) -> logits (B, 3) f32.  `packed` comes from pack_params."""
    B = x.shape[0]
    d_in = packed["d_in"]
    h1, h2, n_out = packed["h1"], packed["h2"], packed["n_out"]
    cdt = packed["compute_dtype"]

    x2d = x.reshape(B, -1).astype(cdt)                           # x.view(B, -1)
    assert x2d.shape[1] == d_in

    # ---- row tile: large (amortize ~0.35us/step overhead) but capped so the
    # grid has >= 2 steps whenever possible (v7x megacore; pipelining). -------
    b8 = _round_up(max(B, 1), 8)
    tb = min(block_rows, max(8, _round_up(pl.cdiv(b8, 2), 8)))
    b_pad = _round_up(b8, tb)
    if b_pad != B:
        x2d = jnp.pad(x2d, ((0, b_pad - B), (0, 0)))             # zero rows: safe
    grid = (b_pad // tb,)

    p1, p2, p3 = packed["p1"], packed["p2"], packed["p3"]
    esz = jnp.dtype(cdt).itemsize
    cost = pl.CostEstimate(
        flops=2 * b_pad * (d_in * h1 + h1 * h2 + h2 * OUT_W)
              + 10 * b_pad * (h1 + h2),
        transcendentals=2 * b_pad,                               # rsqrt per LN row
        bytes_accessed=esz * (x2d.size + p1.size + p2.size + p3.size)
                       + 4 * b_pad * OUT_W,
    )

    kernel = functools.partial(mlp3_kernel, d_in=d_in, h1=h1, h2=h2)

    out = pl.pallas_call(
        kernel,
        out_shape=jax.ShapeDtypeStruct((b_pad, OUT_W), jnp.float32),
        grid_spec=pltpu.PrefetchScalarGridSpec(
            num_scalar_prefetch=0,
            grid=grid,
            in_specs=[
                pl.BlockSpec((tb, d_in), lambda i: (i, 0)),      # batched x
                pl.BlockSpec(p1.shape, lambda i: (0, 0)),        # weights stay
                pl.BlockSpec(p2.shape, lambda i: (0, 0)),        #   VMEM-resident
                pl.BlockSpec(p3.shape, lambda i: (0, 0)),
            ],
            out_specs=pl.BlockSpec((tb, OUT_W), lambda i: (i, 0)),
        ),
        compiler_params=pltpu.CompilerParams(
            dimension_semantics=("parallel",),                   # v7x: 2 TCs
        ),
        cost_estimate=cost,
    )(x2d, p1, p2, p3)

    return out[:B, :n_out]


def init_params(key, input_size, predict_steps):
    """Deterministic synthetic init mirroring the module's __init__ shapes.

    fc1/fc2 kaiming-uniform, fc3 xavier-uniform, fc biases zero (per
    _init_weights); LayerNorm gamma=1, beta=0 (nn.LayerNorm defaults).
    Linear weights are stored transposed to (in, out) for the kernel.
    """
    h1 = predict_steps * 64
    h2 = predict_steps * 16
    k1, k2, k3 = jax.random.split(key, 3)

    def kaiming_uniform(k, fan_in, fan_out):
        bound = jnp.sqrt(6.0 / fan_in)
        return jax.random.uniform(k, (fan_in, fan_out), jnp.float32, -bound, bound)

    def xavier_uniform(k, fan_in, fan_out):
        bound = jnp.sqrt(6.0 / (fan_in + fan_out))
        return jax.random.uniform(k, (fan_in, fan_out), jnp.float32, -bound, bound)

    return {
        "w1": kaiming_uniform(k1, input_size, h1),
        "b1": jnp.zeros((1, h1), jnp.float32),
        "g1": jnp.ones((1, h1), jnp.float32),
        "bt1": jnp.zeros((1, h1), jnp.float32),
        "w2": kaiming_uniform(k2, h1, h2),
        "b2": jnp.zeros((1, h2), jnp.float32),
        "g2": jnp.ones((1, h2), jnp.float32),
        "bt2": jnp.zeros((1, h2), jnp.float32),
        "w3": xavier_uniform(k3, h2, 3),
        "b3": jnp.zeros((1, 3), jnp.float32),
    }


if __name__ == "__main__":
    # input_shape = (B, T, F): input_size = T * F = 8 * 4 = 32; predict_steps = 2
    B, T, F = 2, 8, 4
    predict_steps = 2

    key = jax.random.PRNGKey(0)
    kx, kp, kx2 = jax.random.split(key, 3)
    x = jax.random.normal(kx, (B, T, F), jnp.float32)
    params = init_params(kp, T * F, predict_steps)

    # Pure-JAX reference of the same math (two-pass LN, f32 everywhere).
    def ref(x, p):
        h = x.reshape(x.shape[0], -1) @ p["w1"] + p["b1"]
        mu = h.mean(-1, keepdims=True); v = ((h - mu) ** 2).mean(-1, keepdims=True)
        h = jnp.maximum((h - mu) / jnp.sqrt(v + LN_EPS) * p["g1"] + p["bt1"], 0)
        h = h @ p["w2"] + p["b2"]
        mu = h.mean(-1, keepdims=True); v = ((h - mu) ** 2).mean(-1, keepdims=True)
        h = jnp.maximum((h - mu) / jnp.sqrt(v + LN_EPS) * p["g2"] + p["bt2"], 0)
        return h @ p["w3"] + p["b3"]

    ref_out = ref(x, params)

    # ---- f32 path (exact PyTorch semantics), packing hoisted out of forward.
    packed_f32 = pack_params(params, compute_dtype=jnp.float32)
    fwd_f32 = jax.jit(lambda xx: dnn_3layers_forward(xx, packed_f32))
    out = jax.block_until_ready(fwd_f32(x))
    assert out.shape == (B, 3) and out.dtype == jnp.float32
    assert jnp.allclose(out, ref_out, atol=1e-4, rtol=1e-4)

    # ---- larger batch: exercises padding + multi-step grid (megacore path).
    B2 = 300
    x2 = jax.random.normal(kx2, (B2, T, F), jnp.float32)
    out2 = jax.block_until_ready(fwd_f32(x2))
    assert out2.shape == (B2, 3)
    assert jnp.allclose(out2, ref(x2, params), atol=1e-4, rtol=1e-4)

    # ---- bf16 MXU-input path (auto-picked on v6e/v7x); looser tolerance.
    packed_bf16 = pack_params(params, compute_dtype=jnp.bfloat16)
    fwd_bf16 = jax.jit(lambda xx: dnn_3layers_forward(xx, packed_bf16))
    out_bf16 = jax.block_until_ready(fwd_bf16(x))
    assert out_bf16.shape == (B, 3)
    assert jnp.allclose(out_bf16, ref_out, atol=1e-1, rtol=1e-1)

    # preferred_compute_dtype() is what a production caller would pass in.
    _ = preferred_compute_dtype()

    print("KERNEL_OK")
</pallas_src>

<mosaic_0001>
module attributes {stable_mosaic.version = 11 : i64} {
  func.func @mlp3_kernel(%arg0: i32, %arg1: memref<8x32xf32, #tpu.memory_space<vmem>>, %arg2: memref<35x128xf32, #tpu.memory_space<vmem>>, %arg3: memref<131x32xf32, #tpu.memory_space<vmem>>, %arg4: memref<33x8xf32, #tpu.memory_space<vmem>>, %arg5: memref<8x8xf32, #tpu.memory_space<vmem>>) attributes {dimension_semantics = [#tpu.dimension_semantics<parallel>], iteration_bounds = array<i64: 1>, scalar_prefetch = 0 : i64, scratch_operands = 0 : i64, tpu.core_type = #tpu.core_type<tc>, window_params = [{transform_indices = @transform_0, window_bounds = array<i64: 8, 32>}, {pipeline_mode = #tpu.pipeline_mode<synchronous>, transform_indices = @transform_1, window_bounds = array<i64: 35, 128>}, {pipeline_mode = #tpu.pipeline_mode<synchronous>, transform_indices = @transform_2, window_bounds = array<i64: 131, 32>}, {pipeline_mode = #tpu.pipeline_mode<synchronous>, transform_indices = @transform_3, window_bounds = array<i64: 33, 8>}, {transform_indices = @transform_4, window_bounds = array<i64: 8, 8>}]} {
    %c0 = arith.constant 0 : index
    %c0_0 = arith.constant 0 : index
    %0 = vector.load %arg1[%c0, %c0_0] : memref<8x32xf32, #tpu.memory_space<vmem>>, vector<8x32xf32>
    %c0_1 = arith.constant 0 : index
    %c0_2 = arith.constant 0 : index
    %1 = vector.load %arg2[%c0_1, %c0_2] : memref<35x128xf32, #tpu.memory_space<vmem>>, vector<32x128xf32>
    %cst = arith.constant dense<0.000000e+00> : vector<8x128xf32>
    %2 = tpu.matmul %0, %1, %cst {dimension_numbers = #tpu.dot_dimension_numbers<[1], [0], [0], [1], [0, 0, 1, 1], [], []>} : vector<8x32xf32>, vector<32x128xf32>, vector<8x128xf32> -> vector<8x128xf32>
    %c32 = arith.constant 32 : index
    %c0_3 = arith.constant 0 : index
    %3 = vector.load %arg2[%c32, %c0_3] : memref<35x128xf32, #tpu.memory_space<vmem>>, vector<1x128xf32>
    %4 = vector.broadcast %3 : vector<1x128xf32> to vector<8x128xf32>
    %5 = arith.addf %2, %4 : vector<8x128xf32>
    %c33 = arith.constant 33 : index
    %c0_4 = arith.constant 0 : index
    %6 = vector.load %arg2[%c33, %c0_4] : memref<35x128xf32, #tpu.memory_space<vmem>>, vector<1x128xf32>
    %c34 = arith.constant 34 : index
    %c0_5 = arith.constant 0 : index
    %7 = vector.load %arg2[%c34, %c0_5] : memref<35x128xf32, #tpu.memory_space<vmem>>, vector<1x128xf32>
    %cst_6 = arith.constant dense<0.000000e+00> : vector<8xf32>
    %8 = vector.multi_reduction <add>, %5, %cst_6 [1] : vector<8x128xf32> to vector<8xf32>
    %9 = vector.shape_cast %8 : vector<8xf32> to vector<8x1xf32>
    %10 = arith.mulf %5, %5 : vector<8x128xf32>
    %cst_7 = arith.constant dense<0.000000e+00> : vector<8xf32>
    %11 = vector.multi_reduction <add>, %10, %cst_7 [1] : vector<8x128xf32> to vector<8xf32>
    %12 = vector.shape_cast %11 : vector<8xf32> to vector<8x1xf32>
    %cst_8 = arith.constant 7.812500e-03 : f32
    %13 = vector.broadcast %cst_8 : f32 to vector<8x1xf32>
    %14 = arith.mulf %9, %13 : vector<8x1xf32>
    %cst_9 = arith.constant 7.812500e-03 : f32
    %15 = vector.broadcast %cst_9 : f32 to vector<8x1xf32>
    %16 = arith.mulf %12, %15 : vector<8x1xf32>
    %17 = arith.mulf %14, %14 : vector<8x1xf32>
    %18 = arith.subf %16, %17 : vector<8x1xf32>
    %cst_10 = arith.constant 0.000000e+00 : f32
    %19 = vector.broadcast %cst_10 : f32 to vector<8x1xf32>
    %20 = arith.maximumf %18, %19 : vector<8x1xf32>
    %21 = vector.broadcast %14 : vector<8x1xf32> to vector<8x128xf32>
    %22 = arith.subf %5, %21 : vector<8x128xf32>
    %cst_11 = arith.constant 9.99999974E-6 : f32
    %23 = vector.broadcast %cst_11 : f32 to vector<8x1xf32>
    %24 = arith.addf %20, %23 : vector<8x1xf32>
    %25 = math.rsqrt %24 : vector<8x1xf32>
    %26 = vector.broadcast %25 : vector<8x1xf32> to vector<8x128xf32>
    %27 = arith.mulf %22, %26 : vector<8x128xf32>
    %28 = vector.broadcast %6 : vector<1x128xf32> to vector<8x128xf32>
    %29 = arith.mulf %27, %28 : vector<8x128xf32>
    %30 = vector.broadcast %7 : vector<1x128xf32> to vector<8x128xf32>
    %31 = arith.addf %29, %30 : vector<8x128xf32>
    %cst_12 = arith.constant 0.000000e+00 : f32
    %32 = vector.broadcast %cst_12 : f32 to vector<8x128xf32>
    %33 = arith.maximumf %31, %32 : vector<8x128xf32>
    %c0_13 = arith.constant 0 : index
    %c0_14 = arith.constant 0 : index
    %34 = vector.load %arg3[%c0_13, %c0_14] : memref<131x32xf32, #tpu.memory_space<vmem>>, vector<128x32xf32>
    %cst_15 = arith.constant dense<0.000000e+00> : vector<8x32xf32>
    %35 = tpu.matmul %33, %34, %cst_15 {dimension_numbers = #tpu.dot_dimension_numbers<[1], [0], [0], [1], [0, 0, 1, 1], [], []>} : vector<8x128xf32>, vector<128x32xf32>, vector<8x32xf32> -> vector<8x32xf32>
    %c128 = arith.constant 128 : index
    %c0_16 = arith.constant 0 : index
    %36 = vector.load %arg3[%c128, %c0_16] : memref<131x32xf32, #tpu.memory_space<vmem>>, vector<1x32xf32>
    %37 = vector.broadcast %36 : vector<1x32xf32> to vector<8x32xf32>
    %38 = arith.addf %35, %37 : vector<8x32xf32>
    %c129 = arith.constant 129 : index
    %c0_17 = arith.constant 0 : index
    %39 = vector.load %arg3[%c129, %c0_17] : memref<131x32xf32, #tpu.memory_space<vmem>>, vector<1x32xf32>
    %c130 = arith.constant 130 : index
    %c0_18 = arith.constant 0 : index
    %40 = vector.load %arg3[%c130, %c0_18] : memref<131x32xf32, #tpu.memory_space<vmem>>, vector<1x32xf32>
    %cst_19 = arith.constant dense<0.000000e+00> : vector<8xf32>
    %41 = vector.multi_reduction <add>, %38, %cst_19 [1] : vector<8x32xf32> to vector<8xf32>
    %42 = vector.shape_cast %41 : vector<8xf32> to vector<8x1xf32>
    %43 = arith.mulf %38, %38 : vector<8x32xf32>
    %cst_20 = arith.constant dense<0.000000e+00> : vector<8xf32>
    %44 = vector.multi_reduction <add>, %43, %cst_20 [1] : vector<8x32xf32> to vector<8xf32>
    %45 = vector.shape_cast %44 : vector<8xf32> to vector<8x1xf32>
    %cst_21 = arith.constant 3.125000e-02 : f32
    %46 = vector.broadcast %cst_21 : f32 to vector<8x1xf32>
    %47 = arith.mulf %42, %46 : vector<8x1xf32>
    %cst_22 = arith.constant 3.125000e-02 : f32
    %48 = vector.broadcast %cst_22 : f32 to vector<8x1xf32>
    %49 = arith.mulf %45, %48 : vector<8x1xf32>
    %50 = arith.mulf %47, %47 : vector<8x1xf32>
    %51 = arith.subf %49, %50 : vector<8x1xf32>
    %cst_23 = arith.constant 0.000000e+00 : f32
    %52 = vector.broadcast %cst_23 : f32 to vector<8x1xf32>
    %53 = arith.maximumf %51, %52 : vector<8x1xf32>
    %54 = vector.broadcast %47 : vector<8x1xf32> to vector<8x32xf32>
    %55 = arith.subf %38, %54 : vector<8x32xf32>
    %cst_24 = arith.constant 9.99999974E-6 : f32
    %56 = vector.broadcast %cst_24 : f32 to vector<8x1xf32>
    %57 = arith.addf %53, %56 : vector<8x1xf32>
    %58 = math.rsqrt %57 : vector<8x1xf32>
    %59 = vector.broadcast %58 : vector<8x1xf32> to vector<8x32xf32>
    %60 = arith.mulf %55, %59 : vector<8x32xf32>
    %61 = vector.broadcast %39 : vector<1x32xf32> to vector<8x32xf32>
    %62 = arith.mulf %60, %61 : vector<8x32xf32>
    %63 = vector.broadcast %40 : vector<1x32xf32> to vector<8x32xf32>
    %64 = arith.addf %62, %63 : vector<8x32xf32>
    %cst_25 = arith.constant 0.000000e+00 : f32
    %65 = vector.broadcast %cst_25 : f32 to vector<8x32xf32>
    %66 = arith.maximumf %64, %65 : vector<8x32xf32>
    %c0_26 = arith.constant 0 : index
    %c0_27 = arith.constant 0 : index
    %67 = vector.load %arg4[%c0_26, %c0_27] : memref<33x8xf32, #tpu.memory_space<vmem>>, vector<32x8xf32>
    %cst_28 = arith.constant dense<0.000000e+00> : vector<8x8xf32>
    %68 = tpu.matmul %66, %67, %cst_28 {dimension_numbers = #tpu.dot_dimension_numbers<[1], [0], [0], [1], [0, 0, 1, 1], [], []>} : vector<8x32xf32>, vector<32x8xf32>, vector<8x8xf32> -> vector<8x8xf32>
    %c32_29 = arith.constant 32 : index
    %c0_30 = arith.constant 0 : index
    %69 = vector.load %arg4[%c32_29, %c0_30] : memref<33x8xf32, #tpu.memory_space<vmem>>, vector<1x8xf32>
    %70 = vector.broadcast %69 : vector<1x8xf32> to vector<8x8xf32>
    %71 = arith.addf %68, %70 : vector<8x8xf32>
    %c0_31 = arith.constant 0 : index
    %c0_32 = arith.constant 0 : index
    %72 = vector.load %arg5[%c0_31, %c0_32] : memref<8x8xf32, #tpu.memory_space<vmem>>, vector<8x8xf32>
    tpu.vector_store %arg5[%c0_31, %c0_32], %71 {strides = array<i32>} : memref<8x8xf32, #tpu.memory_space<vmem>>, vector<8x8xf32>,
    return
  }
  func.func @transform_0(%arg0: i32) -> (i32, i32) {
    %c0_i32 = arith.constant 0 : i32
    %c0_i32_0 = arith.constant 0 : i32
    return %arg0, %c0_i32 : i32, i32
  }
  func.func @transform_1(%arg0: i32) -> (i32, i32) {
    %c0_i32 = arith.constant 0 : i32
    %c0_i32_0 = arith.constant 0 : i32
    %c0_i32_1 = arith.constant 0 : i32
    return %c0_i32, %c0_i32_0 : i32, i32
  }
  func.func @transform_2(%arg0: i32) -> (i32, i32) {
    %c0_i32 = arith.constant 0 : i32
    %c0_i32_0 = arith.constant 0 : i32
    %c0_i32_1 = arith.constant 0 : i32
    return %c0_i32, %c0_i32_0 : i32, i32
  }
  func.func @transform_3(%arg0: i32) -> (i32, i32) {
    %c0_i32 = arith.constant 0 : i32
    %c0_i32_0 = arith.constant 0 : i32
    %c0_i32_1 = arith.constant 0 : i32
    return %c0_i32, %c0_i32_0 : i32, i32
  }
  func.func @transform_4(%arg0: i32) -> (i32, i32) {
    %c0_i32 = arith.constant 0 : i32
    %c0_i32_0 = arith.constant 0 : i32
    return %arg0, %c0_i32 : i32, i32
  }
}

</mosaic_0001>

<bundles_post_ra>
// kernel: _lambda_.1
= control target key start
LH: loop header
LB: loop body
LE: loop exit
PB: predicated region body
PF: predicated region fallthrough
CT: control target
= control target key end

     0   :  { %9 = vsyncpa [#allocation3], 0  ;;  %s650_s0 = inlined_call_operand.vmem [shape: f32[8,32], index: 0, kind: input, shape index: {}]   ;;  %s651_s1 = inlined_call_operand.hbm [shape: f32[35,128], index: 1, kind: input, shape index: {}]   ;;  %s652_s2 = inlined_call_operand.hbm [shape: f32[131,32], index: 2, kind: input, shape index: {}]   ;;  %s653_s3 = inlined_call_operand.vmem [shape: f32[33,8], index: 3, kind: input, shape index: {}]   ;;  %s654_s4 = inlined_call_operand.vmem [shape: f32[8,8], index: 4, kind: output, shape index: {}]  }
   0x1   :  { %10 = vsyncpa [#allocation5], 0  ;;  %s554_s15 = smov [#allocation2]   ;;  %s506_s19 = scalar_lea.hbm %s651_s1, 640 }
   0x2   :  { %s18_s16 = sshll.u32 %s554_s15, 4  ;;  %p507_p0 = scmp.ne.s32.totalorder %s651_s1, %s506_s19  ;;  %s19_s16 = int_to_ptr.vmem [resolvable:$true] %s18_s16 }
   0x3   :  { %p510_p1 = scmp.lt.u32.totalorder %s506_s19, %s651_s1 }
   0x5   :  { %p512_p2 = pnand %p510_p1, %p507_p0 }
   0x7   :  { %515 = shalt.err (!%p512_p2)
}
   0x8   :  { %s516_s24 = scalar_lea.vmem %s19_s16, 640  ;;  %p521_p4 = scmp.lt.s32.totalorder %s19_s16, %s19_s16 }
   0x9   :  { %p517_p3 = scmp.ne.s32.totalorder %s19_s16, %s516_s24  ;;  %p522_p5 = scmp.lt.s32.totalorder %s516_s24, %s516_s24 }
   0xb   :  { %p523_p6 = por %p522_p5, %p521_p4 }
   0xd   :  { %p524_p7 = pnand %p523_p6, %p517_p3 }
   0xf   :  { %527 = shalt.err (!%p524_p7)
}
  0x10   :  { %s555_s25 = smov 128   ;;  %s556_s26 = smov 8  }
  0x11   :  { %24 = dma.hbm_to_vmem [thread:$0]  %s651_s1, 640, %s19_s16, [#allocation3], %s555_s25, %s555_s25, %s556_s26  }
  0x12   :  { %s557_s29 = smov [#allocation4]   ;;  %s528_s7 = scalar_lea.hbm %s652_s2, 2176 }
  0x13   :  { %s30_s30 = sshll.u32 %s557_s29, 4  ;;  %p529_p8 = scmp.ne.s32.totalorder %s652_s2, %s528_s7  ;;  %s31_s30 = int_to_ptr.vmem [resolvable:$true] %s30_s30 }
  0x14   :  { %p532_p9 = scmp.lt.u32.totalorder %s528_s7, %s652_s2 }
  0x16   :  { %p534_p10 = pnand %p532_p9, %p529_p8 }
  0x18   :  { %537 = shalt.err (!%p534_p10)
}
  0x19   :  { %s538_s12 = scalar_lea.vmem %s31_s30, 2176  ;;  %p543_p12 = scmp.lt.s32.totalorder %s31_s30, %s31_s30 }
  0x1a   :  { %p539_p11 = scmp.ne.s32.totalorder %s31_s30, %s538_s12  ;;  %p544_p13 = scmp.lt.s32.totalorder %s538_s12, %s538_s12 }
  0x1c   :  { %p545_p0 = por %p544_p13, %p543_p12 }
  0x1e   :  { %p546_p1 = pnand %p545_p0, %p539_p11 }
  0x20   :  { %549 = shalt.err (!%p546_p1)
}
  0x21   :  { %36 = dma.hbm_to_vmem [thread:$0]  %s652_s2, 2176, %s31_s30, [#allocation5], %s555_s25, %s555_s25, %s556_s26  }
  0x22   :  { %550 = dma.done.wait [#allocation3], 640  }
  0x23   :  { %551 = vsyncadd [#allocation3], 4294966656 }
  0x24   :  { %552 = dma.done.wait [#allocation5], 2176  }
  0x25   :  { %553 = vsyncadd [#allocation5], 4294965120  ;;  %v558_v0 = vmov 0.0|0.0   ;;  %vm559_vm0 = vmmov 0   ;;  %v560_v1 = vmov 0.0   ;;  %v46_v2 = vld [vmem:[#allocation2] sm:$0xff] }
  0x26   :  { %459 = vmatprep.subr.bf16.mxu0 %v558_v0  ;;  %410 = vmatprep.mubr.msk.f32.mxu0 %vm559_vm0, %v560_v1  ;;  %v47_v3 = vld [vmem:[#allocation2 + $0x8] sm:$0xff]  ;;  %v48_v4 = vld [vmem:[#allocation2 + $0x10] sm:$0xff]  ;;  %v49_v6 = vld [vmem:[#allocation2 + $0x18] sm:$0xff]  ;;  %vm55_vm1 = vcmask 261120   ;;  %vm358_vm2 = vcmask 64512  }
  0x27   :  { %465 = vmatprep.subr.bf16.mxu1 %v558_v0  ;;  %445 = vmatprep.mubr.msk.f32.mxu1 %vm559_vm0, %v560_v1  ;;  %v460_v5 = vpack.c.bf16 %v47_v3, %v46_v2  ;;  %v463_v7 = vpack.c.bf16 %v49_v6, %v48_v4  ;;  %v45_v8 = vld [vmem:[%s650_s0] sm:$0xff]  ;;  %v366_v9 = vld [vmem:[#allocation2 + $0x20] ss:$0 sm:$0xff]  ;;  %v156_v14 = vld [vmem:[#allocation4] sm:$0xff] }
  0x28   :  { %v157_v15 = vld [vmem:[#allocation4 + $0x8] sm:$0xff]  ;;  %v158_v17 = vld [vmem:[#allocation4 + $0x10] sm:$0xff]  ;;  %v159_v18 = vld [vmem:[#allocation4 + $0x18] sm:$0xff] }
  0x29   :  { %461 = vmatpush3.bf16.msra.mxu0 %v460_v5  ;;  %v466_v16 = vpack.c.bf16 %v157_v15, %v156_v14  ;;  %v469_v19 = vpack.c.bf16 %v159_v18, %v158_v17  ;;  %v160_v20 = vld [vmem:[#allocation4 + $0x20] sm:$0xff]  ;;  %v161_v21 = vld [vmem:[#allocation4 + $0x28] sm:$0xff]  ;;  %v162_v23 = vld [vmem:[#allocation4 + $0x30] sm:$0xff] }
  0x2a   :  { %462 = vmatprep.subr.bf16.mxu0 %v558_v0  ;;  %v472_v22 = vpack.c.bf16 %v161_v21, %v160_v20  ;;  %v163_v24 = vld [vmem:[#allocation4 + $0x38] sm:$0xff]  ;;  %v164_v26 = vld [vmem:[#allocation4 + $0x40] sm:$0xff]  ;;  %v165_v27 = vld [vmem:[#allocation4 + $0x48] sm:$0xff] }
  0x2b   :  { %467 = vmatpush3.bf16.msra.mxu1 %v466_v16  ;;  %v475_v25 = vpack.c.bf16 %v163_v24, %v162_v23  ;;  %v478_v28 = vpack.c.bf16 %v165_v27, %v164_v26  ;;  %v166_v29 = vld [vmem:[#allocation4 + $0x50] sm:$0xff]  ;;  %v167_v30 = vld [vmem:[#allocation4 + $0x58] sm:$0xff]  ;;  %v168_v32 = vld [vmem:[#allocation4 + $0x60] sm:$0xff] }
  0x2c   :  { %468 = vmatprep.subr.bf16.mxu1 %v558_v0  ;;  %v481_v31 = vpack.c.bf16 %v167_v30, %v166_v29  ;;  %v169_v33 = vld [vmem:[#allocation4 + $0x68] sm:$0xff]  ;;  %v170_v35 = vld [vmem:[#allocation4 + $0x70] sm:$0xff]  ;;  %v171_v36 = vld [vmem:[#allocation4 + $0x78] sm:$0xff] }
  0x2d   :  { %464 = vmatpush3.bf16.msra.mxu0 %v463_v7  ;;  %v484_v34 = vpack.c.bf16 %v169_v33, %v168_v32  ;;  %v487_v37 = vpack.c.bf16 %v171_v36, %v170_v35  ;;  %v368_v48 = vld [vmem:[#allocation2 + $0x21] ss:$0 sm:$0xff]  ;;  %v369_v50 = vld [vmem:[#allocation2 + $0x22] ss:$0 sm:$0xff]  ;;  %v370_v54 = vld [vmem:[#allocation4 + $0x80] ss:$0 sm:$0xff] }
  0x2e   :  { %489 = vmatprep.subr.bf16.mxu0 %v558_v0  ;;  %v276_v61 = vld [vmem:[%s653_s3] sm:$0xff]  ;;  %v277_v62 = vld [vmem:[%s653_s3 + $0x8] sm:$0xff]  ;;  %v279_v2 = vld [vmem:[%s653_s3 + $0x18] sm:$0xff] }
  0x2f   :  { %470 = vmatpush3.bf16.msra.mxu1 %v469_v19  ;;  %v490_v63 = vpack.c.bf16 %v277_v62, %v276_v61  ;;  %v371_v14 = vld [vmem:[#allocation4 + $0x81] ss:$0 sm:$0xff]  ;;  %v372_v16 = vld [vmem:[#allocation4 + $0x82] ss:$0 sm:$0xff] }
  0x30   :  { %411 = vmatmul.mubr.msk.f32.vlgmr.msra.gmra.mrb[0].mxu0 %vm55_vm1, %v45_v8  ;;  %471 = vmatprep.subr.bf16.mxu1 %v558_v0 }
  0x31   :  { %456 = vmatprep.mubr.msk.f32.mxu0 %vm559_vm0, %v560_v1  ;;  %v278_v1 = vld [vmem:[%s653_s3 + $0x10] sm:$0xff]  ;;  %491 = vmatpush3.bf16.msra.mxu0 %v490_v63 }
  0x32   :  { %v493_v3 = vpack.c.bf16 %v279_v2, %v278_v1  ;;  %492 = vmatprep.subr.bf16.mxu0 %v558_v0 }
  0x33   :  { %473 = vmatpush3.bf16.msra.mxu1 %v472_v22 }
  0x34   :  { %474 = vmatprep.subr.bf16.mxu1 %v558_v0 }
  0x35   :  { %494 = vmatpush3.bf16.msra.mxu0 %v493_v3 }
  0x37   :  { %476 = vmatpush3.bf16.msra.mxu1 %v475_v25 }
  0x38   :  { %477 = vmatprep.subr.bf16.mxu1 %v558_v0 }
  0x3b   :  { %479 = vmatpush3.bf16.msra.mxu1 %v478_v28 }
  0x3c   :  { %480 = vmatprep.subr.bf16.mxu1 %v558_v0 }
  0x3f   :  { %482 = vmatpush3.bf16.msra.mxu1 %v481_v31 }
  0x40   :  { %483 = vmatprep.subr.bf16.mxu1 %v558_v0 }
  0x43   :  { %485 = vmatpush3.bf16.msra.mxu1 %v484_v34 }
  0x44   :  { %486 = vmatprep.subr.bf16.mxu1 %v558_v0  ;;  %v373_v0 = vld [vmem:[%s653_s3 + $0x20] ss:$0 sm:$0xff] }
  0x47   :  { %488 = vmatpush3.bf16.msra.mxu1 %v487_v37 }
 0x103   :  { %v125_v10 = vpop.f32.mrb[0].mxu0 }
 0x104   :  { %v126_v11 = vadd.f32 %v366_v9, %v125_v10  ;;  %v412_v12 = vpop.f32.mrb[1].mxu0 }
 0x106   :  { %131 = vadd.xlane.f32.xlu0 %v126_v11  ;;  %v133_v13 = vmul.f32 %v126_v11, %v126_v11 }
 0x10a   :  { %134 = vadd.xlane.f32.xlu0 %v133_v13 }
 0x193   :  { %v132_v38 = vpop.xlane.xlu0 %131 }
 0x194   :  { %v136_v39 = vmul.f32 0.0078125, %v132_v38 }
 0x196   :  { %v138_v41 = vmul.f32 %v136_v39, %v136_v39  ;;  %v141_v46 = vsub.f32 %v126_v11, %v136_v39 }
 0x197   :  { %v135_v40 = vpop.xlane.xlu0 %134 }
 0x198   :  { %v137_v42 = vmul.f32 0.0078125, %v135_v40 }
 0x19a   :  { %v139_v43 = vsub.f32 %v137_v42, %v138_v41 }
 0x19c   :  { %v140_v44 = vmax.f32 %v139_v43, 0.0 }
 0x19e   :  { %v142_v45 = vadd.f32 1e-05, %v140_v44 }
 0x1a0   :  { %502 = vrsqrt.f32 %v142_v45 }
 0x1aa   :  { %v503_v47 = vpop.eup %502 }
 0x1ab   :  { %v144_v49 = vmul.f32 %v503_v47, %v141_v46 }
 0x1ad   :  { %v149_v51 = vmul.f32 %v368_v48, %v144_v49 }
 0x1af   :  { %v154_v52 = vadd.f32 %v369_v50, %v149_v51 }
 0x1b1   :  { %v155_v53 = vmax.f32 %v154_v52, 0.0 }
 0x1b3   :  { %446 = vmatmul.mubr.f32.vlgmr.msra.gmra.mrb[0].mxu1 %v155_v53 }
 0x286   :  { %v243_v55 = vpop.f32.mrb[0].mxu1 }
 0x287   :  { %v244_v56 = vadd.f32 %v370_v54, %v243_v55  ;;  %v447_v57 = vpop.f32.mrb[1].mxu1 }
 0x289   :  { %v249_v58 = vsel %vm55_vm1, %v244_v56, 0.0  ;;  %v252_v59 = vmul.f32 %v244_v56, %v244_v56 }
 0x28a   :  { %250 = vadd.xlane.f32.xlu1 %v249_v58 }
 0x28b   :  { %v253_v60 = vsel %vm55_vm1, %v252_v59, 0.0 }
 0x28e   :  { %254 = vadd.xlane.f32.xlu1 %v253_v60 }
 0x317   :  { %v251_v4 = vpop.xlane.xlu1 %250 }
 0x318   :  { %v256_v5 = vmul.f32 0.03125, %v251_v4 }
 0x31a   :  { %v258_v7 = vmul.f32 %v256_v5, %v256_v5  ;;  %v261_v12 = vsub.f32 %v244_v56, %v256_v5 }
 0x31b   :  { %v255_v6 = vpop.xlane.xlu1 %254 }
 0x31c   :  { %v257_v8 = vmul.f32 0.03125, %v255_v6 }
 0x31e   :  { %v259_v9 = vsub.f32 %v257_v8, %v258_v7 }
 0x320   :  { %v260_v10 = vmax.f32 %v259_v9, 0.0 }
 0x322   :  { %v262_v11 = vadd.f32 1e-05, %v260_v10 }
 0x324   :  { %504 = vrsqrt.f32 %v262_v11 }
 0x32e   :  { %v505_v13 = vpop.eup %504 }
 0x32f   :  { %v264_v15 = vmul.f32 %v505_v13, %v261_v12 }
 0x331   :  { %v269_v17 = vmul.f32 %v371_v14, %v264_v15 }
 0x333   :  { %v274_v18 = vadd.f32 %v372_v16, %v269_v17 }
 0x335   :  { %v275_v19 = vmax.f32 %v274_v18, 0.0 }
 0x337   :  { %457 = vmatmul.mubr.msk.f32.vlgmr.msra.gmra.mrb[2].mxu0 %vm55_vm1, %v275_v19 }
 0x40a   :  { %v354_v20 = vpop.f32.mrb[2].mxu0 }
 0x40b   :  { %v355_v21 = vadd.f32 %v373_v0, %v354_v20  ;;  %v458_v22 = vpop.f32.mrb[3].mxu0 }
 0x40d   :  { %359 = vst.msk [vmem:[%s654_s4] sm:$0xff] %vm358_vm2, %v355_v21 }
 0x40e   :  { %364 = vsyncpa [#allocation3], 1 }
 0x40f   :  { %365 = vsyncpa [#allocation5], 1 }

</bundles_post_ra>
